<compile_context>
chip_gen: v7x
topology: tpu7x:2x2x1
jax: 0.10.0
libtpu: 0.0.40
codegen_flags: <defaults>
</compile_context>

<pallas_src>
import functools

import numpy as np
import jax
import jax.numpy as jnp
from jax.experimental import pallas as pl
from jax.experimental.pallas import tpu as pltpu

_POS_WEIGHT = 1.1          # pos_weight of refer_bce_loss
_CE_W0, _CE_W1 = 0.9, 1.1  # cross-entropy class weights from the module
_LOG2E = 1.4426950408889634


def _cdiv(a, b):
    return -(-a // b)


# ---------------------------------------------------------------------------
# bilinear interpolation matrices (PyTorch align_corners=False semantics)
# ---------------------------------------------------------------------------
def _bilinear_matrix(out_size: int, in_size: int) -> np.ndarray:
    scale = in_size / out_size
    o = np.arange(out_size, dtype=np.float64)
    src = (o + 0.5) * scale - 0.5
    src = np.maximum(src, 0.0)
    i0 = np.minimum(np.floor(src), in_size - 1).astype(np.int64)
    i1 = np.minimum(i0 + 1, in_size - 1)
    lam1 = np.clip(src - i0, 0.0, 1.0)
    lam0 = 1.0 - lam1
    m = np.zeros((out_size, in_size), dtype=np.float32)
    np.add.at(m, (np.arange(out_size), i0), lam0)
    np.add.at(m, (np.arange(out_size), i1), lam1)
    return m


# ---------------------------------------------------------------------------
# per-generation VMEM budget / H-tile planning
# ---------------------------------------------------------------------------
def _vmem_limit_bytes() -> int:
    phys = 64 << 20                       # conservative default (v7x physical)
    try:
        phys = int(pltpu.get_tpu_info().vmem_capacity_bytes)
    except Exception:
        pass
    # leave 16 MiB headroom; 96 MiB on v5e/v6e (128 MiB phys), 48 MiB on v7x.
    return int(min(max(phys - (16 << 20), 32 << 20), 96 << 20))


def _plan_h_tile(H: int, W: int, hs: int, ws: int, vmem_limit: int) -> int:
    """Largest multiple-of-8 H tile (<=512 rows) that keeps kernel-1 resident
    VMEM under ~75% of vmem_limit."""
    fixed = 4 * 4 * ws * W          # rwt + rwtd (f32, double-buffered)
    fixed += 2 * 4 * hs * W         # mid_pred + mid_gt scratches
    fixed += 4 * 4 * 8 * W          # four (1, W) accumulators (sublane padded)
    fixed += 4 * 4 * hs * ws        # pred block + mini output (double-buffered)
    per_row = 12 * 4 * W            # live f32 loss-body temporaries
    per_row += 2 * 2 * W            # gt tile (bf16, double-buffered)
    per_row += 4 * 4 * hs           # rh (th,hs) + rhd (hs,th) tiles, f32, dbl-buf
    avail = int(0.75 * vmem_limit) - fixed
    th = max(8, avail // per_row) if avail > 0 else 8
    th = int(min(th, 512))
    th = max(8, (th // 8) * 8)
    if H >= 8:
        th = min(th, (H // 8) * 8)  # avoid block > dim; tail handled by masking
    return th


# ---------------------------------------------------------------------------
# shared in-kernel loss math
# ---------------------------------------------------------------------------
def _loss_terms(x, t):
    """x, t: f32 2-D tiles.  Returns (bce * entropy_weight, sigmoid(x))."""
    e = jnp.exp(-jnp.abs(x))
    sp = jnp.maximum(-x, 0.0) + jnp.log(1.0 + e)          # softplus(-x)
    # BCEWithLogits(pos_weight=1.1) = (1-t)x + (1+0.1t)sp = x + sp + t(0.1sp - x)
    bce = x + sp + t * ((_POS_WEIGHT - 1.0) * sp - x)
    p = jnp.where(x >= 0.0, 1.0, e) / (1.0 + e)           # sigmoid(x), reuses e
    # entropy weight: max(ent_bits, 0.5)*2 - 0.5 == max(2*log2e*(sp+(1-p)x)-0.5, 0.5)
    ent_w = jnp.maximum((2.0 * _LOG2E) * (sp + (1.0 - p) * x) - 0.5, 0.5)
    return bce * ent_w, p


def _pack4(s0, s1, s2, s3):
    """Pack four (1,1) scalars into one (1,4) row (pure VPU selects)."""
    lane = jax.lax.broadcasted_iota(jnp.int32, (1, 4), 1)
    return (jnp.where(lane == 0, s0, 0.0) + jnp.where(lane == 1, s1, 0.0)
            + jnp.where(lane == 2, s2, 0.0) + jnp.where(lane == 3, s3, 0.0))


# ---------------------------------------------------------------------------
# kernel 1: fused [upsample last pred mask] + [BCE*ent / dice partials]
#           + [downsample GT -> mini],  single pass over gt
# grid = (B, n_splits, H tiles); accumulators live in VMEM scratch across tiles
# ---------------------------------------------------------------------------
def _final_loss_kernel(pred_ref, rh_ref, rwt_ref, gt_ref, rhd_ref, rwtd_ref,
                       sums_ref, mini_ref,
                       midp_ref, midg_ref, abce_ref, apt_ref, ap_ref, at_ref,
                       *, th, H, tiles_per_split, has_tail):
    ht = pl.program_id(2)

    @pl.when(ht == 0)
    def _init():
        # cache mid = pred @ rwt once per (b, split): one matmul per tile later
        midp_ref[...] = jnp.dot(pred_ref[0, 0].astype(jnp.float32), rwt_ref[...],
                                preferred_element_type=jnp.float32)     # (hs, W)
        midg_ref[...] = jnp.zeros_like(midg_ref)
        abce_ref[...] = jnp.zeros_like(abce_ref)
        apt_ref[...] = jnp.zeros_like(apt_ref)
        ap_ref[...] = jnp.zeros_like(ap_ref)
        at_ref[...] = jnp.zeros_like(at_ref)

    t = gt_ref[0].astype(jnp.float32)                                   # (th, W)
    if has_tail:
        row0 = (pl.program_id(1) * tiles_per_split + ht) * th
        valid = (jax.lax.broadcasted_iota(jnp.int32, (th, 1), 0) + row0) < H
        t = jnp.where(valid, t, 0.0)     # select: garbage tail rows -> exact 0

    # fused GT downsample (rows): mid_gt += rhd[:, rows] @ gt[rows, :]
    midg_ref[...] += jnp.dot(rhd_ref[0], t, preferred_element_type=jnp.float32)

    # fused upsample of the last pred mask for this tile: (th,hs)@(hs,W)
    x = jnp.dot(rh_ref[...], midp_ref[...], preferred_element_type=jnp.float32)

    q_bce, p = _loss_terms(x, t)
    q_pt = p * t
    if has_tail:                         # rows >= H: bce(0,0)*ent and p=0.5 != 0
        q_bce = jnp.where(valid, q_bce, 0.0)
        p = jnp.where(valid, p, 0.0)

    # row-direction partial sums only; cross-lane reduce deferred to finalize
    abce_ref[...] += jnp.sum(q_bce, axis=0, keepdims=True)
    apt_ref[...] += jnp.sum(q_pt, axis=0, keepdims=True)
    ap_ref[...] += jnp.sum(p, axis=0, keepdims=True)
    at_ref[...] += jnp.sum(t, axis=0, keepdims=True)

    @pl.when(ht == pl.num_programs(2) - 1)
    def _finalize():
        # downsampled GT for the aux layers: (hs,W)@(W,ws)
        mini_ref[0, 0] = jnp.dot(midg_ref[...], rwtd_ref[...],
                                 preferred_element_type=jnp.float32)

        def lsum(a_ref):
            return jnp.sum(a_ref[...], axis=-1, keepdims=True)          # (1,1)

        sums_ref[0, 0] = _pack4(lsum(abce_ref), lsum(apt_ref),
                                lsum(ap_ref), lsum(at_ref))


def final_and_mini_losses(pred_masks, gt_bf16, h_tile=None):
    """pred_masks: (L,B,hs,ws) (last layer used).  gt_bf16: (B,H,W) bfloat16.
    Returns:
      sums: (B, 1, 4) f32 -> [sum(bce*ent), sum(p*t), sum(p), sum(t)] per image
      mini: (B, hs, ws) f32 bilinearly-downsampled GT (for the aux layers)."""
    L, B, hs, ws = pred_masks.shape
    _, H, W = gt_bf16.shape

    vmem_limit = _vmem_limit_bytes()
    th = int(h_tile) if h_tile is not None else _plan_h_tile(H, W, hs, ws, vmem_limit)
    n_valid = _cdiv(H, th)
    # split the H reduction in two parallel chunks when B is odd so both v7x
    # TensorCores get work (no effect on single-TC v5e/v6e).
    n_splits = 2 if (B % 2 == 1 and n_valid >= 2) else 1
    tiles_per_split = _cdiv(n_valid, n_splits)
    n_tiles = n_splits * tiles_per_split
    Hp = n_tiles * th
    has_tail = (Hp != H)

    rh = _bilinear_matrix(H, hs)                   # (H, hs)   upsample rows
    rhd = _bilinear_matrix(hs, H)                  # (hs, H)   downsample rows
    rwt = _bilinear_matrix(W, ws).T.copy()         # (ws, W)   upsample cols^T
    rwtd = _bilinear_matrix(ws, W).T.copy()        # (W, ws)   downsample cols^T
    if has_tail:                                   # zero-pad to the cdiv grid
        rh = np.pad(rh, ((0, Hp - H), (0, 0)))
        rhd = np.pad(rhd, ((0, 0), (0, Hp - H)))
    # reshape rhd to (n_tiles, hs, th) so its block's last two dims are full
    rhd3 = np.ascontiguousarray(rhd.reshape(hs, n_tiles, th).transpose(1, 0, 2))

    rh = jnp.asarray(rh)
    rhd3 = jnp.asarray(rhd3)
    rwt = jnp.asarray(rwt)
    rwtd = jnp.asarray(rwtd)

    tps = tiles_per_split
    last_valid = n_valid - 1
    if has_tail:
        # clamp so fully out-of-range tiles re-read a valid (masked) block
        gt_map = lambda b, s, ht: (b, jnp.minimum(s * tps + ht, last_valid), 0)
    else:
        gt_map = lambda b, s, ht: (b, s * tps + ht, 0)

    grid = (B, n_splits, tiles_per_split)
    in_specs = [
        pl.BlockSpec((1, 1, hs, ws), lambda b, s, ht: (L - 1, b, 0, 0)),
        pl.BlockSpec((th, hs), lambda b, s, ht: (s * tps + ht, 0)),
        pl.BlockSpec((ws, W), lambda b, s, ht: (0, 0)),
        pl.BlockSpec((1, th, W), gt_map),
        pl.BlockSpec((1, hs, th), lambda b, s, ht: (s * tps + ht, 0, 0)),
        pl.BlockSpec((W, ws), lambda b, s, ht: (0, 0)),
    ]
    out_specs = [
        pl.BlockSpec((1, 1, 1, 4), lambda b, s, ht: (b, s, 0, 0)),
        pl.BlockSpec((1, 1, hs, ws), lambda b, s, ht: (b, s, 0, 0)),
    ]
    out_shape = (jax.ShapeDtypeStruct((B, n_splits, 1, 4), jnp.float32),
                 jax.ShapeDtypeStruct((B, n_splits, hs, ws), jnp.float32))
    scratch = [
        pltpu.VMEM((hs, W), jnp.float32),   # mid_pred = pred @ rwt
        pltpu.VMEM((hs, W), jnp.float32),   # mid_gt accumulator
        pltpu.VMEM((1, W), jnp.float32),    # acc bce*ent
        pltpu.VMEM((1, W), jnp.float32),    # acc p*t
        pltpu.VMEM((1, W), jnp.float32),    # acc p
        pltpu.VMEM((1, W), jnp.float32),    # acc t
    ]
    kernel = functools.partial(_final_loss_kernel, th=th, H=H,
                               tiles_per_split=tiles_per_split, has_tail=has_tail)
    sums, mini = pl.pallas_call(
        kernel,
        out_shape=out_shape,
        grid_spec=pltpu.PrefetchScalarGridSpec(
            num_scalar_prefetch=0, grid=grid,
            in_specs=in_specs, out_specs=out_specs, scratch_shapes=scratch),
        compiler_params=pltpu.CompilerParams(
            dimension_semantics=("parallel", "parallel", "arbitrary"),
            vmem_limit_bytes=vmem_limit),
    )(pred_masks, rh, rwt, gt_bf16, rhd3, rwtd)
    # combine the H-split partial results (linear, so mini also just sums)
    return jnp.sum(sums, axis=1), jnp.sum(mini, axis=1)


# ---------------------------------------------------------------------------
# kernel 2: aux-layer BCE*ent / dice partials against the precomputed mini-GT
# grid = (B, L-1), both axes "parallel"
# ---------------------------------------------------------------------------
def _aux_loss_kernel(pred_ref, mini_ref, sums_ref):
    x = pred_ref[0, 0].astype(jnp.float32)                  # (hs, ws)
    t = mini_ref[0]                                         # (hs, ws) f32
    q_bce, p = _loss_terms(x, t)

    def tot(v):
        return jnp.sum(jnp.sum(v, axis=-1, keepdims=True), axis=-2, keepdims=True)

    sums_ref[0, 0] = _pack4(tot(q_bce), tot(p * t), tot(p), tot(t))


def aux_losses(pred_masks, mini):
    """pred_masks: (L,B,hs,ws) (layers 0..L-2).  mini: (B,hs,ws) f32.
    Returns (B, L-1, 1, 4): [sum(bce*ent), sum(p*t), sum(p), sum(t)]."""
    L, B, hs, ws = pred_masks.shape
    La = L - 1
    grid_spec = pltpu.PrefetchScalarGridSpec(
        num_scalar_prefetch=0, grid=(B, La),
        in_specs=[pl.BlockSpec((1, 1, hs, ws), lambda b, la: (la, b, 0, 0)),
                  pl.BlockSpec((1, hs, ws), lambda b, la: (b, 0, 0))],
        out_specs=pl.BlockSpec((1, 1, 1, 4), lambda b, la: (b, la, 0, 0)))
    return pl.pallas_call(
        _aux_loss_kernel,
        out_shape=jax.ShapeDtypeStruct((B, La, 1, 4), jnp.float32),
        grid_spec=grid_spec,
        compiler_params=pltpu.CompilerParams(
            dimension_semantics=("parallel", "parallel")),
    )(pred_masks, mini)


# ---------------------------------------------------------------------------
# 2-class weighted cross-entropy on nt_label (reduction='none' + .mean()) —
# plain jnp: the (Lc,B,2) tensor is far below one vreg; a kernel launch would
# dominate.
# ---------------------------------------------------------------------------
def ce_losses(nt_label, target_nts):
    x = nt_label.astype(jnp.float32)                        # (Lc, B, 2)
    lse = jax.scipy.special.logsumexp(x, axis=-1)           # (Lc, B)
    onehot = jax.nn.one_hot(target_nts, 2, dtype=jnp.float32)
    xt = jnp.sum(x * onehot[None], axis=-1)
    w = jnp.where(target_nts == 1, _CE_W1, _CE_W0)
    return (lse - xt) * w[None, :]


# ---------------------------------------------------------------------------
# ReferringCriterion.forward  (loss_masks_refer)
# ---------------------------------------------------------------------------
def referring_criterion_forward(pred_masks, nt_label, gt_masks, target_nts,
                                so=False, h_tile=None):
    """pred_masks: (L,B,hs,ws) — last layer is the final out_mask.
       nt_label  : (L-1,B,2) logits,  target_nts: (B,) int class labels.
       gt_masks  : (B,H,W) binary float GT masks (same size across the batch).
       h_tile    : optional static H-tile override (testing)."""
    L, Bsz, hs, ws = pred_masks.shape
    _, H, W = gt_masks.shape

    # 0/1 GT is exact in bf16; halves the dominant HBM read of kernel 1.
    gt_bf16 = gt_masks.astype(jnp.bfloat16)

    # final path (A, D) + fused GT downsample (single pass over gt)
    sums_f, mini = final_and_mini_losses(pred_masks, gt_bf16, h_tile=h_tile)
    bce_f = sums_f[..., 0]
    pt_f = sums_f[..., 1]
    ps_f = sums_f[..., 2]
    ts_f = sums_f[..., 3]
    A = jnp.sum(bce_f) / (Bsz * H * W)
    D = jnp.mean(1.0 - (2.0 * pt_f + 1.0) / (ps_f + ts_f + 1.0))

    # aux path (B, E): per-layer losses against the precomputed mini-GT
    sums_a = aux_losses(pred_masks, mini)                   # (B, L-1, 1, 4)
    B_loss = jnp.sum(sums_a[..., 0]) / ((L - 1) * Bsz * hs * ws)
    E = jnp.mean(1.0 - (2.0 * sums_a[..., 1] + 1.0)
                 / (sums_a[..., 2] + sums_a[..., 3] + 1.0))

    losses = {'A': A, 'B': B_loss, 'D': D, 'E': E}
    if not so:
        losses['C'] = jnp.mean(ce_losses(nt_label, target_nts))
    return losses


# ---------------------------------------------------------------------------
# pure-JAX reference (PyTorch math, incl. the 1e-6 entropy eps) for sanity check
# ---------------------------------------------------------------------------
def _reference(pred_masks, nt_label, gt_masks, target_nts):
    L, Bsz, hs, ws = pred_masks.shape
    _, H, W = gt_masks.shape
    rh_u = jnp.asarray(_bilinear_matrix(H, hs))
    rw_u = jnp.asarray(_bilinear_matrix(W, ws))
    rh_d = jnp.asarray(_bilinear_matrix(hs, H))
    rw_d = jnp.asarray(_bilinear_matrix(ws, W))
    out_mask = jnp.einsum('oh,bhw,xw->box', rh_u, pred_masks[-1], rw_u)
    mini = jnp.einsum('oh,bhw,xw->box', rh_d, gt_masks, rw_d)

    def bce_ent(x, t):
        sp = jnp.maximum(-x, 0.) + jnp.log(1. + jnp.exp(-jnp.abs(x)))
        bce = (1. - t) * x + (1. + (_POS_WEIGHT - 1.) * t) * sp
        p = jax.nn.sigmoid(x)
        ent = (-p * jnp.log(p + 1e-6) - (1 - p) * jnp.log(1 - p + 1e-6)) * _LOG2E
        return jnp.mean(bce * (jnp.maximum(ent, 0.5) * 2. - 0.5))

    def dice(x, t):
        p = jax.nn.sigmoid(x).reshape(x.shape[0], -1)
        t = t.reshape(t.shape[0], -1)
        num = 2 * jnp.sum(p * t, 1)
        den = jnp.sum(p, 1) + jnp.sum(t, 1)
        return jnp.mean(1 - (num + 1) / (den + 1))

    A = bce_ent(out_mask, gt_masks)
    Bv = jnp.mean(jnp.stack([bce_ent(pred_masks[i], mini) for i in range(L - 1)]))
    D = dice(out_mask, gt_masks)
    E = jnp.mean(jnp.stack([dice(pred_masks[i], mini) for i in range(L - 1)]))
    onehot = jax.nn.one_hot(target_nts, 2)
    lse = jax.scipy.special.logsumexp(nt_label, axis=-1)
    xt = jnp.sum(nt_label * onehot[None], -1)
    w = jnp.where(target_nts == 1, _CE_W1, _CE_W0)
    C = jnp.mean((lse - xt) * w[None, :])
    return {'A': A, 'B': Bv, 'C': C, 'D': D, 'E': E}


if __name__ == "__main__":
    # TODO(synk): nested_tensor_from_tensor_list padding/valid-mask not modeled;
    # all GT masks are assumed to share the same (H, W).
    fwd = jax.jit(referring_criterion_forward, static_argnames=("so", "h_tile"))

    def run_case(L, B, hs, ws, H, W, h_tile=None):
        key = jax.random.PRNGKey(0)
        k1, k2, k3, k4 = jax.random.split(key, 4)
        pred_masks = jax.random.normal(k1, (L, B, hs, ws), jnp.float32)
        nt_label = jax.random.normal(k2, (L - 1, B, 2), jnp.float32)
        gt_masks = (jax.random.uniform(k3, (B, H, W)) > 0.5).astype(jnp.float32)
        target_nts = jax.random.randint(k4, (B,), 0, 2)
        losses = jax.block_until_ready(
            fwd(pred_masks, nt_label, gt_masks, target_nts, so=False, h_tile=h_tile))
        ref = _reference(pred_masks, nt_label, gt_masks, target_nts)
        for k in ref:
            assert np.isfinite(float(losses[k])), (k, losses[k])
            np.testing.assert_allclose(float(losses[k]), float(ref[k]),
                                       rtol=1e-4, atol=1e-4)

    # case 1: even shapes, B>1 (single H split, no tail masking)
    run_case(L=4, B=2, hs=8, ws=8, H=16, W=16)
    # case 2: B==1 (H reduction split into 2 "parallel" chunks for v7x) with a
    # ragged H -> exercises the cdiv grid, masked tail tile and clamped gt index
    run_case(L=3, B=1, hs=8, ws=8, H=20, W=24, h_tile=8)
    print("KERNEL_OK")
</pallas_src>

<mosaic_0001>
module attributes {stable_mosaic.version = 11 : i64} {
  func.func @_aux_loss_kernel(%arg0: i32, %arg1: i32, %arg2: memref<1x1x8x8xf32, #tpu.memory_space<vmem>>, %arg3: memref<1x8x8xf32, #tpu.memory_space<vmem>>, %arg4: memref<1x1x1x4xf32, #tpu.memory_space<vmem>>) attributes {dimension_semantics = [#tpu.dimension_semantics<parallel>, #tpu.dimension_semantics<parallel>], iteration_bounds = array<i64: 2, 3>, scalar_prefetch = 0 : i64, scratch_operands = 0 : i64, tpu.core_type = #tpu.core_type<tc>, window_params = [{transform_indices = @transform_0, window_bounds = array<i64: 1, 1, 8, 8>}, {transform_indices = @transform_1, window_bounds = array<i64: 1, 8, 8>}, {transform_indices = @transform_2, window_bounds = array<i64: 1, 1, 1, 4>}]} {
    %c0 = arith.constant 0 : index
    %c0_0 = arith.constant 0 : index
    %c0_1 = arith.constant 0 : index
    %c0_2 = arith.constant 0 : index
    %0 = vector.load %arg2[%c0, %c0_0, %c0_1, %c0_2] : memref<1x1x8x8xf32, #tpu.memory_space<vmem>>, vector<1x1x8x8xf32>
    %1 = vector.shape_cast %0 : vector<1x1x8x8xf32> to vector<8x8xf32>
    %c0_3 = arith.constant 0 : index
    %c0_4 = arith.constant 0 : index
    %c0_5 = arith.constant 0 : index
    %2 = vector.load %arg3[%c0_3, %c0_4, %c0_5] : memref<1x8x8xf32, #tpu.memory_space<vmem>>, vector<1x8x8xf32>
    %3 = vector.shape_cast %2 : vector<1x8x8xf32> to vector<8x8xf32>
    %4 = math.absf %1 : vector<8x8xf32>
    %cst = arith.constant 0.000000e+00 : f32
    %5 = vector.broadcast %cst : f32 to vector<8x8xf32>
    %6 = arith.subf %5, %4 : vector<8x8xf32>
    %7 = math.exp %6 : vector<8x8xf32>
    %cst_6 = arith.constant 0.000000e+00 : f32
    %8 = vector.broadcast %cst_6 : f32 to vector<8x8xf32>
    %9 = arith.subf %8, %1 : vector<8x8xf32>
    %cst_7 = arith.constant 0.000000e+00 : f32
    %10 = vector.broadcast %cst_7 : f32 to vector<8x8xf32>
    %11 = arith.maximumf %9, %10 : vector<8x8xf32>
    %cst_8 = arith.constant 1.000000e+00 : f32
    %12 = vector.broadcast %cst_8 : f32 to vector<8x8xf32>
    %13 = arith.addf %12, %7 : vector<8x8xf32>
    %14 = math.log %13 : vector<8x8xf32>
    %15 = arith.addf %11, %14 : vector<8x8xf32>
    %16 = arith.addf %1, %15 : vector<8x8xf32>
    %cst_9 = arith.constant 1.000000e-01 : f32
    %17 = vector.broadcast %cst_9 : f32 to vector<8x8xf32>
    %18 = arith.mulf %17, %15 : vector<8x8xf32>
    %19 = arith.subf %18, %1 : vector<8x8xf32>
    %20 = arith.mulf %3, %19 : vector<8x8xf32>
    %21 = arith.addf %16, %20 : vector<8x8xf32>
    %cst_10 = arith.constant 0.000000e+00 : f32
    %22 = vector.broadcast %cst_10 : f32 to vector<8x8xf32>
    %23 = arith.cmpf oge, %1, %22 : vector<8x8xf32>
    %cst_11 = arith.constant 1.000000e+00 : f32
    %24 = vector.broadcast %cst_11 : f32 to vector<8x8xf32>
    %25 = arith.select %23, %24, %7 : vector<8x8xi1>, vector<8x8xf32>
    %cst_12 = arith.constant 1.000000e+00 : f32
    %26 = vector.broadcast %cst_12 : f32 to vector<8x8xf32>
    %27 = arith.addf %26, %7 : vector<8x8xf32>
    %28 = arith.divf %25, %27 : vector<8x8xf32>
    %cst_13 = arith.constant 1.000000e+00 : f32
    %29 = vector.broadcast %cst_13 : f32 to vector<8x8xf32>
    %30 = arith.subf %29, %28 : vector<8x8xf32>
    %31 = arith.mulf %30, %1 : vector<8x8xf32>
    %32 = arith.addf %15, %31 : vector<8x8xf32>
    %cst_14 = arith.constant 2.885390e+00 : f32
    %33 = vector.broadcast %cst_14 : f32 to vector<8x8xf32>
    %34 = arith.mulf %33, %32 : vector<8x8xf32>
    %cst_15 = arith.constant 5.000000e-01 : f32
    %35 = vector.broadcast %cst_15 : f32 to vector<8x8xf32>
    %36 = arith.subf %34, %35 : vector<8x8xf32>
    %cst_16 = arith.constant 5.000000e-01 : f32
    %37 = vector.broadcast %cst_16 : f32 to vector<8x8xf32>
    %38 = arith.maximumf %36, %37 : vector<8x8xf32>
    %39 = arith.mulf %21, %38 : vector<8x8xf32>
    %cst_17 = arith.constant dense<0.000000e+00> : vector<8xf32>
    %40 = vector.multi_reduction <add>, %39, %cst_17 [1] : vector<8x8xf32> to vector<8xf32>
    %41 = vector.shape_cast %40 : vector<8xf32> to vector<8x1xf32>
    %cst_18 = arith.constant dense<0.000000e+00> : vector<1xf32>
    %42 = vector.multi_reduction <add>, %41, %cst_18 [0] : vector<8x1xf32> to vector<1xf32>
    %43 = vector.shape_cast %42 : vector<1xf32> to vector<1x1xf32>
    %44 = arith.mulf %28, %3 : vector<8x8xf32>
    %cst_19 = arith.constant dense<0.000000e+00> : vector<8xf32>
    %45 = vector.multi_reduction <add>, %44, %cst_19 [1] : vector<8x8xf32> to vector<8xf32>
    %46 = vector.shape_cast %45 : vector<8xf32> to vector<8x1xf32>
    %cst_20 = arith.constant dense<0.000000e+00> : vector<1xf32>
    %47 = vector.multi_reduction <add>, %46, %cst_20 [0] : vector<8x1xf32> to vector<1xf32>
    %48 = vector.shape_cast %47 : vector<1xf32> to vector<1x1xf32>
    %cst_21 = arith.constant dense<0.000000e+00> : vector<8xf32>
    %49 = vector.multi_reduction <add>, %28, %cst_21 [1] : vector<8x8xf32> to vector<8xf32>
    %50 = vector.shape_cast %49 : vector<8xf32> to vector<8x1xf32>
    %cst_22 = arith.constant dense<0.000000e+00> : vector<1xf32>
    %51 = vector.multi_reduction <add>, %50, %cst_22 [0] : vector<8x1xf32> to vector<1xf32>
    %52 = vector.shape_cast %51 : vector<1xf32> to vector<1x1xf32>
    %cst_23 = arith.constant dense<0.000000e+00> : vector<8xf32>
    %53 = vector.multi_reduction <add>, %3, %cst_23 [1] : vector<8x8xf32> to vector<8xf32>
    %54 = vector.shape_cast %53 : vector<8xf32> to vector<8x1xf32>
    %cst_24 = arith.constant dense<0.000000e+00> : vector<1xf32>
    %55 = vector.multi_reduction <add>, %54, %cst_24 [0] : vector<8x1xf32> to vector<1xf32>
    %56 = vector.shape_cast %55 : vector<1xf32> to vector<1x1xf32>
    %57 = tpu.iota {dimensions = array<i32: 1>} : vector<1x4xi32>
    %c0_i32 = arith.constant 0 : i32
    %58 = vector.broadcast %c0_i32 : i32 to vector<1x4xi32>
    %59 = arith.cmpi eq, %57, %58 : vector<1x4xi32>
    %cst_25 = arith.constant 0.000000e+00 : f32
    %60 = vector.shape_cast %43 : vector<1x1xf32> to vector<1x1xf32>
    %61 = vector.broadcast %60 : vector<1x1xf32> to vector<1x4xf32>
    %62 = vector.broadcast %cst_25 : f32 to vector<1x4xf32>
    %63 = arith.select %59, %61, %62 : vector<1x4xi1>, vector<1x4xf32>
    %c1_i32 = arith.constant 1 : i32
    %64 = vector.broadcast %c1_i32 : i32 to vector<1x4xi32>
    %65 = arith.cmpi eq, %57, %64 : vector<1x4xi32>
    %cst_26 = arith.constant 0.000000e+00 : f32
    %66 = vector.shape_cast %48 : vector<1x1xf32> to vector<1x1xf32>
    %67 = vector.broadcast %66 : vector<1x1xf32> to vector<1x4xf32>
    %68 = vector.broadcast %cst_26 : f32 to vector<1x4xf32>
    %69 = arith.select %65, %67, %68 : vector<1x4xi1>, vector<1x4xf32>
    %70 = arith.addf %63, %69 : vector<1x4xf32>
    %c2_i32 = arith.constant 2 : i32
    %71 = vector.broadcast %c2_i32 : i32 to vector<1x4xi32>
    %72 = arith.cmpi eq, %57, %71 : vector<1x4xi32>
    %cst_27 = arith.constant 0.000000e+00 : f32
    %73 = vector.shape_cast %52 : vector<1x1xf32> to vector<1x1xf32>
    %74 = vector.broadcast %73 : vector<1x1xf32> to vector<1x4xf32>
    %75 = vector.broadcast %cst_27 : f32 to vector<1x4xf32>
    %76 = arith.select %72, %74, %75 : vector<1x4xi1>, vector<1x4xf32>
    %77 = arith.addf %70, %76 : vector<1x4xf32>
    %c3_i32 = arith.constant 3 : i32
    %78 = vector.broadcast %c3_i32 : i32 to vector<1x4xi32>
    %79 = arith.cmpi eq, %57, %78 : vector<1x4xi32>
    %cst_28 = arith.constant 0.000000e+00 : f32
    %80 = vector.shape_cast %56 : vector<1x1xf32> to vector<1x1xf32>
    %81 = vector.broadcast %80 : vector<1x1xf32> to vector<1x4xf32>
    %82 = vector.broadcast %cst_28 : f32 to vector<1x4xf32>
    %83 = arith.select %79, %81, %82 : vector<1x4xi1>, vector<1x4xf32>
    %84 = arith.addf %77, %83 : vector<1x4xf32>
    %c0_29 = arith.constant 0 : index
    %c0_30 = arith.constant 0 : index
    %c0_31 = arith.constant 0 : index
    %c0_32 = arith.constant 0 : index
    %85 = vector.load %arg4[%c0_29, %c0_30, %c0_31, %c0_32] : memref<1x1x1x4xf32, #tpu.memory_space<vmem>>, vector<1x1x1x4xf32>
    %86 = vector.shape_cast %85 : vector<1x1x1x4xf32> to vector<1x4xf32>
    %87 = vector.shape_cast %84 : vector<1x4xf32> to vector<1x1x1x4xf32>
    tpu.vector_store %arg4[%c0_29, %c0_30, %c0_31, %c0_32], %87 {strides = array<i32>} : memref<1x1x1x4xf32, #tpu.memory_space<vmem>>, vector<1x1x1x4xf32>,
    return
  }
  func.func @transform_0(%arg0: i32, %arg1: i32) -> (i32, i32, i32, i32) {
    %c0_i32 = arith.constant 0 : i32
    %c0_i32_0 = arith.constant 0 : i32
    %c0_i32_1 = arith.constant 0 : i32
    return %arg1, %arg0, %c0_i32, %c0_i32_0 : i32, i32, i32, i32
  }
  func.func @transform_1(%arg0: i32, %arg1: i32) -> (i32, i32, i32) {
    %c0_i32 = arith.constant 0 : i32
    %c0_i32_0 = arith.constant 0 : i32
    %c0_i32_1 = arith.constant 0 : i32
    return %arg0, %c0_i32, %c0_i32_0 : i32, i32, i32
  }
  func.func @transform_2(%arg0: i32, %arg1: i32) -> (i32, i32, i32, i32) {
    %c0_i32 = arith.constant 0 : i32
    %c0_i32_0 = arith.constant 0 : i32
    %c0_i32_1 = arith.constant 0 : i32
    return %arg0, %arg1, %c0_i32, %c0_i32_0 : i32, i32, i32, i32
  }
}

module attributes {stable_mosaic.version = 11 : i64} {
  func.func @_final_loss_kernel(%arg0: i32, %arg1: i32, %arg2: i32, %arg3: memref<1x1x8x8xf32, #tpu.memory_space<vmem>>, %arg4: memref<16x8xf32, #tpu.memory_space<vmem>>, %arg5: memref<8x16xf32, #tpu.memory_space<vmem>>, %arg6: memref<1x16x16xbf16, #tpu.memory_space<vmem>>, %arg7: memref<1x8x16xf32, #tpu.memory_space<vmem>>, %arg8: memref<16x8xf32, #tpu.memory_space<vmem>>, %arg9: memref<1x1x1x4xf32, #tpu.memory_space<vmem>>, %arg10: memref<1x1x8x8xf32, #tpu.memory_space<vmem>>, %arg11: memref<8x16xf32, #tpu.memory_space<vmem>>, %arg12: memref<8x16xf32, #tpu.memory_space<vmem>>, %arg13: memref<1x16xf32, #tpu.memory_space<vmem>>, %arg14: memref<1x16xf32, #tpu.memory_space<vmem>>, %arg15: memref<1x16xf32, #tpu.memory_space<vmem>>, %arg16: memref<1x16xf32, #tpu.memory_space<vmem>>) attributes {dimension_semantics = [#tpu.dimension_semantics<parallel>, #tpu.dimension_semantics<parallel>, #tpu.dimension_semantics<arbitrary>], iteration_bounds = array<i64: 2, 1, 1>, scalar_prefetch = 0 : i64, scratch_operands = 6 : i64, tpu.core_type = #tpu.core_type<tc>, window_params = [{transform_indices = @transform_0, window_bounds = array<i64: 1, 1, 8, 8>}, {transform_indices = @transform_1, window_bounds = array<i64: 16, 8>}, {pipeline_mode = #tpu.pipeline_mode<synchronous>, transform_indices = @transform_2, window_bounds = array<i64: 8, 16>}, {transform_indices = @transform_3, window_bounds = array<i64: 1, 16, 16>}, {transform_indices = @transform_4, window_bounds = array<i64: 1, 8, 16>}, {pipeline_mode = #tpu.pipeline_mode<synchronous>, transform_indices = @transform_5, window_bounds = array<i64: 16, 8>}, {transform_indices = @transform_6, window_bounds = array<i64: 1, 1, 1, 4>}, {transform_indices = @transform_7, window_bounds = array<i64: 1, 1, 8, 8>}]} {
    %c0_i32 = arith.constant 0 : i32
    %0 = arith.cmpi eq, %arg2, %c0_i32 : i32
    %1 = arith.extui %0 : i1 to i32
    %c0_i32_0 = arith.constant 0 : i32
    %2 = arith.cmpi ne, %1, %c0_i32_0 : i32
    scf.if %2 {
      %c0_49 = arith.constant 0 : index
      %c0_50 = arith.constant 0 : index
      %c0_51 = arith.constant 0 : index
      %c0_52 = arith.constant 0 : index
      %75 = vector.load %arg3[%c0_49, %c0_50, %c0_51, %c0_52] : memref<1x1x8x8xf32, #tpu.memory_space<vmem>>, vector<1x1x8x8xf32>
      %76 = vector.shape_cast %75 : vector<1x1x8x8xf32> to vector<8x8xf32>
      %c0_53 = arith.constant 0 : index
      %c0_54 = arith.constant 0 : index
      %77 = vector.load %arg5[%c0_53, %c0_54] : memref<8x16xf32, #tpu.memory_space<vmem>>, vector<8x16xf32>
      %cst_55 = arith.constant dense<0.000000e+00> : vector<8x16xf32>
      %78 = tpu.matmul %76, %77, %cst_55 {dimension_numbers = #tpu.dot_dimension_numbers<[1], [0], [0], [1], [0, 0, 1, 1], [], []>} : vector<8x8xf32>, vector<8x16xf32>, vector<8x16xf32> -> vector<8x16xf32>
      %c0_56 = arith.constant 0 : index
      %c0_57 = arith.constant 0 : index
      %79 = vector.load %arg11[%c0_56, %c0_57] : memref<8x16xf32, #tpu.memory_space<vmem>>, vector<8x16xf32>
      tpu.vector_store %arg11[%c0_56, %c0_57], %78 {strides = array<i32>} : memref<8x16xf32, #tpu.memory_space<vmem>>, vector<8x16xf32>,
      %cst_58 = arith.constant 0.000000e+00 : f32
      %80 = vector.broadcast %cst_58 : f32 to vector<8x16xf32>
      %c0_59 = arith.constant 0 : index
      %c0_60 = arith.constant 0 : index
      %81 = vector.load %arg12[%c0_59, %c0_60] : memref<8x16xf32, #tpu.memory_space<vmem>>, vector<8x16xf32>
      tpu.vector_store %arg12[%c0_59, %c0_60], %80 {strides = array<i32>} : memref<8x16xf32, #tpu.memory_space<vmem>>, vector<8x16xf32>,
      %cst_61 = arith.constant 0.000000e+00 : f32
      %82 = vector.broadcast %cst_61 : f32 to vector<1x16xf32>
      %c0_62 = arith.constant 0 : index
      %c0_63 = arith.constant 0 : index
      %83 = vector.load %arg13[%c0_62, %c0_63] : memref<1x16xf32, #tpu.memory_space<vmem>>, vector<1x16xf32>
      tpu.vector_store %arg13[%c0_62, %c0_63], %82 {strides = array<i32>} : memref<1x16xf32, #tpu.memory_space<vmem>>, vector<1x16xf32>,
      %cst_64 = arith.constant 0.000000e+00 : f32
      %84 = vector.broadcast %cst_64 : f32 to vector<1x16xf32>
      %c0_65 = arith.constant 0 : index
      %c0_66 = arith.constant 0 : index
      %85 = vector.load %arg14[%c0_65, %c0_66] : memref<1x16xf32, #tpu.memory_space<vmem>>, vector<1x16xf32>
      tpu.vector_store %arg14[%c0_65, %c0_66], %84 {strides = array<i32>} : memref<1x16xf32, #tpu.memory_space<vmem>>, vector<1x16xf32>,
      %cst_67 = arith.constant 0.000000e+00 : f32
      %86 = vector.broadcast %cst_67 : f32 to vector<1x16xf32>
      %c0_68 = arith.constant 0 : index
      %c0_69 = arith.constant 0 : index
      %87 = vector.load %arg15[%c0_68, %c0_69] : memref<1x16xf32, #tpu.memory_space<vmem>>, vector<1x16xf32>
      tpu.vector_store %arg15[%c0_68, %c0_69], %86 {strides = array<i32>} : memref<1x16xf32, #tpu.memory_space<vmem>>, vector<1x16xf32>,
      %cst_70 = arith.constant 0.000000e+00 : f32
      %88 = vector.broadcast %cst_70 : f32 to vector<1x16xf32>
      %c0_71 = arith.constant 0 : index
      %c0_72 = arith.constant 0 : index
      %89 = vector.load %arg16[%c0_71, %c0_72] : memref<1x16xf32, #tpu.memory_space<vmem>>, vector<1x16xf32>
      tpu.vector_store %arg16[%c0_71, %c0_72], %88 {strides = array<i32>} : memref<1x16xf32, #tpu.memory_space<vmem>>, vector<1x16xf32>,
    } else {
    }
    %c0 = arith.constant 0 : index
    %c0_1 = arith.constant 0 : index
    %c0_2 = arith.constant 0 : index
    %3 = vector.load %arg6[%c0, %c0_1, %c0_2] : memref<1x16x16xbf16, #tpu.memory_space<vmem>>, vector<1x16x16xbf16>
    %4 = vector.shape_cast %3 : vector<1x16x16xbf16> to vector<16x16xbf16>
    %5 = arith.extf %4 : vector<16x16xbf16> to vector<16x16xf32>
    %c0_3 = arith.constant 0 : index
    %c0_4 = arith.constant 0 : index
    %6 = vector.load %arg12[%c0_3, %c0_4] : memref<8x16xf32, #tpu.memory_space<vmem>>, vector<8x16xf32>
    %c0_5 = arith.constant 0 : index
    %c0_6 = arith.constant 0 : index
    %c0_7 = arith.constant 0 : index
    %7 = vector.load %arg7[%c0_5, %c0_6, %c0_7] : memref<1x8x16xf32, #tpu.memory_space<vmem>>, vector<1x8x16xf32>
    %8 = vector.shape_cast %7 : vector<1x8x16xf32> to vector<8x16xf32>
    %cst = arith.constant dense<0.000000e+00> : vector<8x16xf32>
    %9 = tpu.matmul %8, %5, %cst {dimension_numbers = #tpu.dot_dimension_numbers<[1], [0], [0], [1], [0, 0, 1, 1], [], []>} : vector<8x16xf32>, vector<16x16xf32>, vector<8x16xf32> -> vector<8x16xf32>
    %10 = arith.addf %6, %9 : vector<8x16xf32>
    %c0_8 = arith.constant 0 : index
    %c0_9 = arith.constant 0 : index
    %11 = vector.load %arg12[%c0_8, %c0_9] : memref<8x16xf32, #tpu.memory_space<vmem>>, vector<8x16xf32>
    tpu.vector_store %arg12[%c0_8, %c0_9], %10 {strides = array<i32>} : memref<8x16xf32, #tpu.memory_space<vmem>>, vector<8x16xf32>,
    %c0_10 = arith.constant 0 : index
    %c0_11 = arith.constant 0 : index
    %12 = vector.load %arg4[%c0_10, %c0_11] : memref<16x8xf32, #tpu.memory_space<vmem>>, vector<16x8xf32>
    %c0_12 = arith.constant 0 : index
    %c0_13 = arith.constant 0 : index
    %13 = vector.load %arg11[%c0_12, %c0_13] : memref<8x16xf32, #tpu.memory_space<vmem>>, vector<8x16xf32>
    %cst_14 = arith.constant dense<0.000000e+00> : vector<16x16xf32>
    %14 = tpu.matmul %12, %13, %cst_14 {dimension_numbers = #tpu.dot_dimension_numbers<[1], [0], [0], [1], [0, 0, 1, 1], [], []>} : vector<16x8xf32>, vector<8x16xf32>, vector<16x16xf32> -> vector<16x16xf32>
    %15 = math.absf %14 : vector<16x16xf32>
    %cst_15 = arith.constant 0.000000e+00 : f32
    %16 = vector.broadcast %cst_15 : f32 to vector<16x16xf32>
    %17 = arith.subf %16, %15 : vector<16x16xf32>
    %18 = math.exp %17 : vector<16x16xf32>
    %cst_16 = arith.constant 0.000000e+00 : f32
    %19 = vector.broadcast %cst_16 : f32 to vector<16x16xf32>
    %20 = arith.subf %19, %14 : vector<16x16xf32>
    %cst_17 = arith.constant 0.000000e+00 : f32
    %21 = vector.broadcast %cst_17 : f32 to vector<16x16xf32>
    %22 = arith.maximumf %20, %21 : vector<16x16xf32>
    %cst_18 = arith.constant 1.000000e+00 : f32
    %23 = vector.broadcast %cst_18 : f32 to vector<16x16xf32>
    %24 = arith.addf %23, %18 : vector<16x16xf32>
    %25 = math.log %24 : vector<16x16xf32>
    %26 = arith.addf %22, %25 : vector<16x16xf32>
    %27 = arith.addf %14, %26 : vector<16x16xf32>
    %cst_19 = arith.constant 1.000000e-01 : f32
    %28 = vector.broadcast %cst_19 : f32 to vector<16x16xf32>
    %29 = arith.mulf %28, %26 : vector<16x16xf32>
    %30 = arith.subf %29, %14 : vector<16x16xf32>
    %31 = arith.mulf %5, %30 : vector<16x16xf32>
    %32 = arith.addf %27, %31 : vector<16x16xf32>
    %cst_20 = arith.constant 0.000000e+00 : f32
    %33 = vector.broadcast %cst_20 : f32 to vector<16x16xf32>
    %34 = arith.cmpf oge, %14, %33 : vector<16x16xf32>
    %cst_21 = arith.constant 1.000000e+00 : f32
    %35 = vector.broadcast %cst_21 : f32 to vector<16x16xf32>
    %36 = arith.select %34, %35, %18 : vector<16x16xi1>, vector<16x16xf32>
    %cst_22 = arith.constant 1.000000e+00 : f32
    %37 = vector.broadcast %cst_22 : f32 to vector<16x16xf32>
    %38 = arith.addf %37, %18 : vector<16x16xf32>
    %39 = arith.divf %36, %38 : vector<16x16xf32>
    %cst_23 = arith.constant 1.000000e+00 : f32
    %40 = vector.broadcast %cst_23 : f32 to vector<16x16xf32>
    %41 = arith.subf %40, %39 : vector<16x16xf32>
    %42 = arith.mulf %41, %14 : vector<16x16xf32>
    %43 = arith.addf %26, %42 : vector<16x16xf32>
    %cst_24 = arith.constant 2.885390e+00 : f32
    %44 = vector.broadcast %cst_24 : f32 to vector<16x16xf32>
    %45 = arith.mulf %44, %43 : vector<16x16xf32>
    %cst_25 = arith.constant 5.000000e-01 : f32
    %46 = vector.broadcast %cst_25 : f32 to vector<16x16xf32>
    %47 = arith.subf %45, %46 : vector<16x16xf32>
    %cst_26 = arith.constant 5.000000e-01 : f32
    %48 = vector.broadcast %cst_26 : f32 to vector<16x16xf32>
    %49 = arith.maximumf %47, %48 : vector<16x16xf32>
    %50 = arith.mulf %32, %49 : vector<16x16xf32>
    %51 = arith.mulf %39, %5 : vector<16x16xf32>
    %c0_27 = arith.constant 0 : index
    %c0_28 = arith.constant 0 : index
    %52 = vector.load %arg13[%c0_27, %c0_28] : memref<1x16xf32, #tpu.memory_space<vmem>>, vector<1x16xf32>
    %cst_29 = arith.constant dense<0.000000e+00> : vector<16xf32>
    %53 = vector.multi_reduction <add>, %50, %cst_29 [0] : vector<16x16xf32> to vector<16xf32>
    %54 = vector.shape_cast %53 : vector<16xf32> to vector<1x16xf32>
    %55 = arith.addf %52, %54 : vector<1x16xf32>
    %c0_30 = arith.constant 0 : index
    %c0_31 = arith.constant 0 : index
    %56 = vector.load %arg13[%c0_30, %c0_31] : memref<1x16xf32, #tpu.memory_space<vmem>>, vector<1x16xf32>
    tpu.vector_store %arg13[%c0_30, %c0_31], %55 {strides = array<i32>} : memref<1x16xf32, #tpu.memory_space<vmem>>, vector<1x16xf32>,
    %c0_32 = arith.constant 0 : index
    %c0_33 = arith.constant 0 : index
    %57 = vector.load %arg14[%c0_32, %c0_33] : memref<1x16xf32, #tpu.memory_space<vmem>>, vector<1x16xf32>
    %cst_34 = arith.constant dense<0.000000e+00> : vector<16xf32>
    %58 = vector.multi_reduction <add>, %51, %cst_34 [0] : vector<16x16xf32> to vector<16xf32>
    %59 = vector.shape_cast %58 : vector<16xf32> to vector<1x16xf32>
    %60 = arith.addf %57, %59 : vector<1x16xf32>
    %c0_35 = arith.constant 0 : index
    %c0_36 = arith.constant 0 : index
    %61 = vector.load %arg14[%c0_35, %c0_36] : memref<1x16xf32, #tpu.memory_space<vmem>>, vector<1x16xf32>
    tpu.vector_store %arg14[%c0_35, %c0_36], %60 {strides = array<i32>} : memref<1x16xf32, #tpu.memory_space<vmem>>, vector<1x16xf32>,
    %c0_37 = arith.constant 0 : index
    %c0_38 = arith.constant 0 : index
    %62 = vector.load %arg15[%c0_37, %c0_38] : memref<1x16xf32, #tpu.memory_space<vmem>>, vector<1x16xf32>
    %cst_39 = arith.constant dense<0.000000e+00> : vector<16xf32>
    %63 = vector.multi_reduction <add>, %39, %cst_39 [0] : vector<16x16xf32> to vector<16xf32>
    %64 = vector.shape_cast %63 : vector<16xf32> to vector<1x16xf32>
    %65 = arith.addf %62, %64 : vector<1x16xf32>
    %c0_40 = arith.constant 0 : index
    %c0_41 = arith.constant 0 : index
    %66 = vector.load %arg15[%c0_40, %c0_41] : memref<1x16xf32, #tpu.memory_space<vmem>>, vector<1x16xf32>
    tpu.vector_store %arg15[%c0_40, %c0_41], %65 {strides = array<i32>} : memref<1x16xf32, #tpu.memory_space<vmem>>, vector<1x16xf32>,
    %c0_42 = arith.constant 0 : index
    %c0_43 = arith.constant 0 : index
    %67 = vector.load %arg16[%c0_42, %c0_43] : memref<1x16xf32, #tpu.memory_space<vmem>>, vector<1x16xf32>
    %cst_44 = arith.constant dense<0.000000e+00> : vector<16xf32>
    %68 = vector.multi_reduction <add>, %5, %cst_44 [0] : vector<16x16xf32> to vector<16xf32>
    %69 = vector.shape_cast %68 : vector<16xf32> to vector<1x16xf32>
    %70 = arith.addf %67, %69 : vector<1x16xf32>
    %c0_45 = arith.constant 0 : index
    %c0_46 = arith.constant 0 : index
    %71 = vector.load %arg16[%c0_45, %c0_46] : memref<1x16xf32, #tpu.memory_space<vmem>>, vector<1x16xf32>
    tpu.vector_store %arg16[%c0_45, %c0_46], %70 {strides = array<i32>} : memref<1x16xf32, #tpu.memory_space<vmem>>, vector<1x16xf32>,
    %c0_i32_47 = arith.constant 0 : i32
    %72 = arith.cmpi eq, %arg2, %c0_i32_47 : i32
    %73 = arith.extui %72 : i1 to i32
    %c0_i32_48 = arith.constant 0 : i32
    %74 = arith.cmpi ne, %73, %c0_i32_48 : i32
    scf.if %74 {
      %c0_49 = arith.constant 0 : index
      %c0_50 = arith.constant 0 : index
      %75 = vector.load %arg12[%c0_49, %c0_50] : memref<8x16xf32, #tpu.memory_space<vmem>>, vector<8x16xf32>
      %c0_51 = arith.constant 0 : index
      %c0_52 = arith.constant 0 : index
      %76 = vector.load %arg8[%c0_51, %c0_52] : memref<16x8xf32, #tpu.memory_space<vmem>>, vector<16x8xf32>
      %cst_53 = arith.constant dense<0.000000e+00> : vector<8x8xf32>
      %77 = tpu.matmul %75, %76, %cst_53 {dimension_numbers = #tpu.dot_dimension_numbers<[1], [0], [0], [1], [0, 0, 1, 1], [], []>} : vector<8x16xf32>, vector<16x8xf32>, vector<8x8xf32> -> vector<8x8xf32>
      %c0_54 = arith.constant 0 : index
      %c0_55 = arith.constant 0 : index
      %c0_56 = arith.constant 0 : index
      %c0_57 = arith.constant 0 : index
      %78 = vector.load %arg10[%c0_54, %c0_55, %c0_56, %c0_57] : memref<1x1x8x8xf32, #tpu.memory_space<vmem>>, vector<1x1x8x8xf32>
      %79 = vector.shape_cast %78 : vector<1x1x8x8xf32> to vector<8x8xf32>
      %80 = vector.shape_cast %77 : vector<8x8xf32> to vector<1x1x8x8xf32>
      tpu.vector_store %arg10[%c0_54, %c0_55, %c0_56, %c0_57], %80 {strides = array<i32>} : memref<1x1x8x8xf32, #tpu.memory_space<vmem>>, vector<1x1x8x8xf32>,
      %c0_58 = arith.constant 0 : index
      %c0_59 = arith.constant 0 : index
      %81 = vector.load %arg13[%c0_58, %c0_59] : memref<1x16xf32, #tpu.memory_space<vmem>>, vector<1x16xf32>
      %cst_60 = arith.constant dense<0.000000e+00> : vector<1xf32>
      %82 = vector.multi_reduction <add>, %81, %cst_60 [1] : vector<1x16xf32> to vector<1xf32>
      %83 = vector.shape_cast %82 : vector<1xf32> to vector<1x1xf32>
      %c0_61 = arith.constant 0 : index
      %c0_62 = arith.constant 0 : index
      %84 = vector.load %arg14[%c0_61, %c0_62] : memref<1x16xf32, #tpu.memory_space<vmem>>, vector<1x16xf32>
      %cst_63 = arith.constant dense<0.000000e+00> : vector<1xf32>
      %85 = vector.multi_reduction <add>, %84, %cst_63 [1] : vector<1x16xf32> to vector<1xf32>
      %86 = vector.shape_cast %85 : vector<1xf32> to vector<1x1xf32>
      %c0_64 = arith.constant 0 : index
      %c0_65 = arith.constant 0 : index
      %87 = vector.load %arg15[%c0_64, %c0_65] : memref<1x16xf32, #tpu.memory_space<vmem>>, vector<1x16xf32>
      %cst_66 = arith.constant dense<0.000000e+00> : vector<1xf32>
      %88 = vector.multi_reduction <add>, %87, %cst_66 [1] : vector<1x16xf32> to vector<1xf32>
      %89 = vector.shape_cast %88 : vector<1xf32> to vector<1x1xf32>
      %c0_67 = arith.constant 0 : index
      %c0_68 = arith.constant 0 : index
      %90 = vector.load %arg16[%c0_67, %c0_68] : memref<1x16xf32, #tpu.memory_space<vmem>>, vector<1x16xf32>
      %cst_69 = arith.constant dense<0.000000e+00> : vector<1xf32>
      %91 = vector.multi_reduction <add>, %90, %cst_69 [1] : vector<1x16xf32> to vector<1xf32>
      %92 = vector.shape_cast %91 : vector<1xf32> to vector<1x1xf32>
      %93 = tpu.iota {dimensions = array<i32: 1>} : vector<1x4xi32>
      %c0_i32_70 = arith.constant 0 : i32
      %94 = vector.broadcast %c0_i32_70 : i32 to vector<1x4xi32>
      %95 = arith.cmpi eq, %93, %94 : vector<1x4xi32>
      %cst_71 = arith.constant 0.000000e+00 : f32
      %96 = vector.shape_cast %83 : vector<1x1xf32> to vector<1x1xf32>
      %97 = vector.broadcast %96 : vector<1x1xf32> to vector<1x4xf32>
      %98 = vector.broadcast %cst_71 : f32 to vector<1x4xf32>
      %99 = arith.select %95, %97, %98 : vector<1x4xi1>, vector<1x4xf32>
      %c1_i32 = arith.constant 1 : i32
      %100 = vector.broadcast %c1_i32 : i32 to vector<1x4xi32>
      %101 = arith.cmpi eq, %93, %100 : vector<1x4xi32>
      %cst_72 = arith.constant 0.000000e+00 : f32
      %102 = vector.shape_cast %86 : vector<1x1xf32> to vector<1x1xf32>
      %103 = vector.broadcast %102 : vector<1x1xf32> to vector<1x4xf32>
      %104 = vector.broadcast %cst_72 : f32 to vector<1x4xf32>
      %105 = arith.select %101, %103, %104 : vector<1x4xi1>, vector<1x4xf32>
      %106 = arith.addf %99, %105 : vector<1x4xf32>
      %c2_i32 = arith.constant 2 : i32
      %107 = vector.broadcast %c2_i32 : i32 to vector<1x4xi32>
      %108 = arith.cmpi eq, %93, %107 : vector<1x4xi32>
      %cst_73 = arith.constant 0.000000e+00 : f32
      %109 = vector.shape_cast %89 : vector<1x1xf32> to vector<1x1xf32>
      %110 = vector.broadcast %109 : vector<1x1xf32> to vector<1x4xf32>
      %111 = vector.broadcast %cst_73 : f32 to vector<1x4xf32>
      %112 = arith.select %108, %110, %111 : vector<1x4xi1>, vector<1x4xf32>
      %113 = arith.addf %106, %112 : vector<1x4xf32>
      %c3_i32 = arith.constant 3 : i32
      %114 = vector.broadcast %c3_i32 : i32 to vector<1x4xi32>
      %115 = arith.cmpi eq, %93, %114 : vector<1x4xi32>
      %cst_74 = arith.constant 0.000000e+00 : f32
      %116 = vector.shape_cast %92 : vector<1x1xf32> to vector<1x1xf32>
      %117 = vector.broadcast %116 : vector<1x1xf32> to vector<1x4xf32>
      %118 = vector.broadcast %cst_74 : f32 to vector<1x4xf32>
      %119 = arith.select %115, %117, %118 : vector<1x4xi1>, vector<1x4xf32>
      %120 = arith.addf %113, %119 : vector<1x4xf32>
      %c0_75 = arith.constant 0 : index
      %c0_76 = arith.constant 0 : index
      %c0_77 = arith.constant 0 : index
      %c0_78 = arith.constant 0 : index
      %121 = vector.load %arg9[%c0_75, %c0_76, %c0_77, %c0_78] : memref<1x1x1x4xf32, #tpu.memory_space<vmem>>, vector<1x1x1x4xf32>
      %122 = vector.shape_cast %121 : vector<1x1x1x4xf32> to vector<1x4xf32>
      %123 = vector.shape_cast %120 : vector<1x4xf32> to vector<1x1x1x4xf32>
      tpu.vector_store %arg9[%c0_75, %c0_76, %c0_77, %c0_78], %123 {strides = array<i32>} : memref<1x1x1x4xf32, #tpu.memory_space<vmem>>, vector<1x1x1x4xf32>,
    } else {
    }
    return
  }
  func.func @transform_0(%arg0: i32, %arg1: i32, %arg2: i32) -> (i32, i32, i32, i32) {
    %c3_i32 = arith.constant 3 : i32
    %c0_i32 = arith.constant 0 : i32
    %c0_i32_0 = arith.constant 0 : i32
    %c0_i32_1 = arith.constant 0 : i32
    return %c3_i32, %arg0, %c0_i32, %c0_i32_0 : i32, i32, i32, i32
  }
  func.func @transform_1(%arg0: i32, %arg1: i32, %arg2: i32) -> (i32, i32) {
    %c1_i32 = arith.constant 1 : i32
    %0 = arith.muli %arg1, %c1_i32 : i32
    %1 = arith.addi %0, %arg2 : i32
    %c0_i32 = arith.constant 0 : i32
    %c0_i32_0 = arith.constant 0 : i32
    return %1, %c0_i32 : i32, i32
  }
  func.func @transform_2(%arg0: i32, %arg1: i32, %arg2: i32) -> (i32, i32) {
    %c0_i32 = arith.constant 0 : i32
    %c0_i32_0 = arith.constant 0 : i32
    %c0_i32_1 = arith.constant 0 : i32
    return %c0_i32, %c0_i32_0 : i32, i32
  }
  func.func @transform_3(%arg0: i32, %arg1: i32, %arg2: i32) -> (i32, i32, i32) {
    %c1_i32 = arith.constant 1 : i32
    %0 = arith.muli %arg1, %c1_i32 : i32
    %1 = arith.addi %0, %arg2 : i32
    %c0_i32 = arith.constant 0 : i32
    %c0_i32_0 = arith.constant 0 : i32
    return %arg0, %1, %c0_i32 : i32, i32, i32
  }
  func.func @transform_4(%arg0: i32, %arg1: i32, %arg2: i32) -> (i32, i32, i32) {
    %c1_i32 = arith.constant 1 : i32
    %0 = arith.muli %arg1, %c1_i32 : i32
    %1 = arith.addi %0, %arg2 : i32
    %c0_i32 = arith.constant 0 : i32
    %c0_i32_0 = arith.constant 0 : i32
    %c0_i32_1 = arith.constant 0 : i32
    return %1, %c0_i32, %c0_i32_0 : i32, i32, i32
  }
  func.func @transform_5(%arg0: i32, %arg1: i32, %arg2: i32) -> (i32, i32) {
    %c0_i32 = arith.constant 0 : i32
    %c0_i32_0 = arith.constant 0 : i32
    %c0_i32_1 = arith.constant 0 : i32
    return %c0_i32, %c0_i32_0 : i32, i32
  }
  func.func @transform_6(%arg0: i32, %arg1: i32, %arg2: i32) -> (i32, i32, i32, i32) {
    %c0_i32 = arith.constant 0 : i32
    %c0_i32_0 = arith.constant 0 : i32
    %c0_i32_1 = arith.constant 0 : i32
    return %arg0, %arg1, %c0_i32, %c0_i32_0 : i32, i32, i32, i32
  }
  func.func @transform_7(%arg0: i32, %arg1: i32, %arg2: i32) -> (i32, i32, i32, i32) {
    %c0_i32 = arith.constant 0 : i32
    %c0_i32_0 = arith.constant 0 : i32
    %c0_i32_1 = arith.constant 0 : i32
    return %arg0, %arg1, %c0_i32, %c0_i32_0 : i32, i32, i32, i32
  }
}

</mosaic_0001>

<bundles_post_ra>
// kernel: referring_criterion_forward.3
= control target key start
LH: loop header
LB: loop body
LE: loop exit
PB: predicated region body
PF: predicated region fallthrough
CT: control target
= control target key end

     0   :  { %s476_s9 = smov 0   ;;  %s478_s10 = smov 0   ;;  %s545_s0 = inlined_call_operand.vmem [shape: f32[4,2,8,8], index: 0, kind: input, shape index: {}]   ;;  %s546_s1 = inlined_call_operand.vmem [shape: f32[2,8,8], index: 1, kind: input, shape index: {}]   ;;  %s547_s2 = inlined_call_operand.vmem [shape: f32[2,3,1,4], index: 2, kind: output, shape index: {}]  }
   0x1   :  { %s480_s11 = smov 0   ;;  %s482_s12 = smov 0  }
   0x2   :  { %s484_s13 = smov 0  }
   0x3 LB: > { %s21_s14 = sadd.s32 1, %s451_s11  ;;  %s24_s15 = sadd.s32 1, %s455_s12  ;;  %s459_s13 = sphi %s484_s13, %s12_s13   ;;  %s455_s12 = sphi %s482_s12, %s551_s12   ;;  %s451_s11 = sphi %s480_s11, %s550_s11   ;;  %s447_s10 = sphi %s478_s10, %s549_s10   ;;  %s443_s9 = sphi %s476_s9, %s548_s9  }
   0x4   : > { %p22_p0 = scmp.ge.s32.totalorder %s21_s14, 3  ;;  %p367_p1 = scmp.ge.s32.totalorder %s459_s13, 1 }
   0x5   : > { %p140_p2 = scmp.lt.s32.totalorder %s459_s13, 7 }
   0x6   : > { %s553_s14 = smov (%p22_p0, %s21_s14), 0  ;;  %s555_s15 = smov (!%p22_p0, %s24_s15), %s455_s12 }
   0x7   : > { %p141_p3 = pnand %p367_p1, %p140_p2  ;;  %p26_p4 = scmp.ge.s32.totalorder %s555_s15, 2 }
   0x8   : > { %p171_p5 = scmp.lt.s32.totalorder (!%p141_p3), %s443_s9, 3  ;;  %p173_p6 = scmp.lt.s32.totalorder (!%p141_p3), %s447_s10, 1  ;;  %vm218_vm1 = vcmask (!%p141_p3), 64512   ;;  %v256_v49 = vlaneseq (!%p141_p3)  ;;  %vm269_vm6 = vcmask (!%p141_p3), 24576  }
   0x9   : > { %s557_s15 = smov (%p26_p4, %s555_s15), 0  ;;  %144 = sbr.rel (%p141_p3) target bundleno = 236 (0xec), region = 28 }
   0xa   : > { %p185_p7 = scmp.lt.s32.totalorder (!%p141_p3), %s443_s9, 2  ;;  %v257_v55 = vand.u32 (!%p141_p3), 127, %v256_v49 }
   0xc   : > { %vm258_vm2 = vcmp.eq.s32.totalorder (!%p141_p3), %v257_v55, 0  ;;  %vm260_vm3 = vcmp.eq.s32.totalorder (!%p141_p3), %v257_v55, 1  ;;  %vm263_vm4 = vcmp.eq.s32.totalorder (!%p141_p3), %v257_v55, 2  ;;  %vm266_vm5 = vcmp.eq.s32.totalorder (!%p141_p3), %v257_v55, 3 }
  0x10   : > { %s172_s16 = scalar_select %p171_p5, %s443_s9, 3 }
  0x11   : > { %s559_s10 = smov (!%p173_p6, %s447_s10), 1  ;;  %s561_s9 = smov (!%p185_p7, %s443_s9), 2 }
  0x12   : > { %s368_s17 = sshll.u32 %s172_s16, 1  ;;  %s370_s23 = sshll.u32 %s559_s10, 3 }
  0x13   : > { %s176_s18 = sadd.s32 %s368_s17, %s559_s10  ;;  %s182_s26 = scalar_lea.vmem %s546_s1, %s370_s23 }
  0x14   : > { %s369_s19 = sshll.u32 %s176_s18, 3  ;;  %v191_v15 = vld [vmem:[%s182_s26] sm:$0xff]  ;;  %s374_s27 = smul.u32 3, %s559_s10 }
  0x15   : > { %s178_s22 = scalar_lea.vmem %s545_s0, %s369_s19  ;;  %v247_v18 = vsel %vm218_vm1, %v191_v15, 0.0 }
  0x16   : > { %v190_v0 = vld [vmem:[%s178_s22] sm:$0xff]  ;;  %s188_s28 = sadd.s32 %s374_s27, %s561_s9 }
  0x17   : > { %v192_v1 = vand.u32 2147483647, %v190_v0  ;;  %vm207_vm0 = vcmp.ge.f32.partialorder %v190_v0, 0.0  ;;  %v196_v6 = vsub.f32 0.0, %v190_v0  ;;  %s189_s3 = scalar_lea.vmem %s547_s2, %s188_s28 }
  0x19   : > { %v193_v2 = vsub.f32 0.0, %v192_v1  ;;  %v197_v9 = vmax.f32 %v196_v6, 0.0 }
  0x1b   : > { %v194_v3 = vmul.f32 1.442695, %v193_v2 }
  0x1d   : > { %415 = vpow2.f32 %v194_v3 }
  0x27   : > { %v416_v4 = vpop.eup %415 }
  0x28   : > { %v198_v5 = vadd.f32 1.0, %v416_v4  ;;  %v208_v7 = vsel %vm207_vm0, 1.0, %v416_v4 }
  0x2a   : > { %417 = vrcp.f32 %v198_v5 }
  0x2b   : > { %419 = vlog2.f32 %v198_v5 }
  0x34   : > { %v418_v8 = vpop.eup %417 }
  0x35   : > { %v420_v10 = vpop.eup %419  ;;  %v210_v11 = vmul.f32 %v418_v8, %v208_v7 }
  0x36   : > { %v200_v12 = vmul.f32 0.6931472, %v420_v10 }
  0x37   : > { %v238_v13 = vsel %vm218_vm1, %v210_v11, 0.0  ;;  %v211_v14 = vsub.f32 1.0, %v210_v11  ;;  %v228_v29 = vmul.f32 %v210_v11, %v191_v15 }
  0x38   : > { %239 = vadd.xlane.f32.xlu1 %v238_v13  ;;  %v201_v16 = vadd.f32 %v200_v12, %v197_v9 }
  0x39   : > { %v212_v17 = vmul.f32 %v211_v14, %v190_v0  ;;  %v229_v31 = vsel %vm218_vm1, %v228_v29, 0.0 }
  0x3a   : > { %v203_v19 = vmul.f32 0.1, %v201_v16  ;;  %v202_v21 = vadd.f32 %v201_v16, %v190_v0 }
  0x3b   : > { %v213_v20 = vadd.f32 %v212_v17, %v201_v16 }
  0x3c   : > { %v204_v22 = vsub.f32 %v203_v19, %v190_v0  ;;  %248 = vadd.xlane.f32.xlu1 %v247_v18 }
  0x3d   : > { %v214_v23 = vmul.f32 2.88539, %v213_v20 }
  0x3e   : > { %v205_v24 = vmul.f32 %v204_v22, %v191_v15 }
  0x3f   : > { %v371_v25 = vadd.f32 -0.5, %v214_v23 }
  0x40   : > { %v206_v26 = vadd.f32 %v205_v24, %v202_v21 }
  0x41   : > { %v216_v27 = vmax.f32 %v371_v25, 0.5 }
  0x43   : > { %v217_v28 = vmul.f32 %v216_v27, %v206_v26 }
  0x45   : > { %v219_v30 = vsel %vm218_vm1, %v217_v28, 0.0 }
  0x46   : > { %220 = vadd.xlane.f32.xlu0 %v219_v30 }
  0x4a   : > { %230 = vadd.xlane.f32.xlu0 %v229_v31 }
  0xc5   : > { %v240_v32 = vpop.xlane.xlu1 %239 }
  0xc6   : > { %v241_v34 = vrot.slane %v240_v32, 4 }
  0xc8   : > { %v242_v36 = vadd.f32 %v241_v34, %v240_v32 }
  0xc9   : > { %v249_v33 = vpop.xlane.xlu1 %248 }
  0xca   : > { %v250_v35 = vrot.slane %v249_v33, 4  ;;  %v243_v40 = vrot.slane %v242_v36, 2 }
  0xcc   : > { %v251_v39 = vadd.f32 %v250_v35, %v249_v33  ;;  %v244_v46 = vadd.f32 %v243_v40, %v242_v36 }
  0xce   : > { %v252_v44 = vrot.slane %v251_v39, 2  ;;  %v245_v53 = vrot.slane %v244_v46, 1 }
  0xd0   : > { %v253_v51 = vadd.f32 %v252_v44, %v251_v39  ;;  %v246_v59 = vadd.f32 %v245_v53, %v244_v46 }
  0xd2   : > { %v254_v57 = vrot.slane %v253_v51, 1  ;;  %v264_v1 = vsel %vm263_vm4, %v246_v59, 0.0 }
  0xd3   : > { %v221_v37 = vpop.xlane.xlu0 %220 }
  0xd4   : > { %v222_v38 = vrot.slane %v221_v37, 4  ;;  %v255_v62 = vadd.f32 %v254_v57, %v253_v51 }
  0xd6   : > { %v223_v41 = vadd.f32 %v222_v38, %v221_v37  ;;  %v267_v3 = vsel %vm266_vm5, %v255_v62, 0.0 }
  0xd7   : > { %v231_v42 = vpop.xlane.xlu0 %230 }
  0xd8   : > { %v224_v43 = vrot.slane %v223_v41, 2  ;;  %v232_v45 = vrot.slane %v231_v42, 4 }
  0xda   : > { %v225_v47 = vadd.f32 %v224_v43, %v223_v41  ;;  %v233_v48 = vadd.f32 %v232_v45, %v231_v42 }
  0xdc   : > { %v226_v50 = vrot.slane %v225_v47, 1  ;;  %v234_v52 = vrot.slane %v233_v48, 2 }
  0xde   : > { %v235_v54 = vadd.f32 %v234_v52, %v233_v48  ;;  %v227_v56 = vadd.f32 %v226_v50, %v225_v47 }
  0xe0   : > { %v236_v58 = vrot.slane %v235_v54, 1  ;;  %v259_v61 = vsel %vm258_vm2, %v227_v56, 0.0 }
  0xe2   : > { %v237_v60 = vadd.f32 %v236_v58, %v235_v54 }
  0xe4   : > { %v261_v63 = vsel %vm260_vm3, %v237_v60, 0.0 }
  0xe5   : > { %v262_v0 = vadd.f32 %v261_v63, %v259_v61 }
  0xe7   : > { %v265_v2 = vadd.f32 %v264_v1, %v262_v0 }
  0xe9   : > { %v268_v4 = vadd.f32 %v267_v3, %v265_v2 }
  0xeb   : > { %270 = vst.msk [vmem:[%s189_s3] sm:$0x1] %vm269_vm6, %v268_v4 }
  0xec PF: > { %s12_s13 = sadd.s32 1, %s459_s13   ;;  %s548_s9 = smov %s451_s11 }
  0xed   : > { %p9_p8 = scmp.ge.s32.totalorder %s12_s13, 8   ;;  %s549_s10 = smov %s455_s12 }
  0xee   : > { %s550_s11 = smov %s553_s14  ;;  %s551_s12 = smov %s557_s15 }
  0xef   :  { %11 = sbr.rel (!%p9_p8) target bundleno = 3 (0x3), region = 61 }

// kernel: referring_criterion_forward.2
= control target key start
LH: loop header
LB: loop body
LE: loop exit
PB: predicated region body
PF: predicated region fallthrough
CT: control target
= control target key end

     0   :  { %13 = vsyncpa [#allocation9], 0  ;;  %s1537_s0 = inlined_call_operand.hbm [shape: f32[4,2,8,8], index: 0, kind: input, shape index: {}]   ;;  %s1538_s1 = inlined_call_operand.vmem [shape: f32[16,8], index: 1, kind: input, shape index: {}]   ;;  %s1539_s2 = inlined_call_operand.vmem [shape: f32[8,16], index: 2, kind: input, shape index: {}]   ;;  %s1540_s3 = inlined_call_operand.vmem [shape: bf16[2,16,16], index: 3, kind: input, shape index: {}]   ;;  %s1541_s4 = inlined_call_operand.vmem [shape: f32[1,8,16], index: 4, kind: input, shape index: {}]   ;;  %s1542_s5 = inlined_call_operand.vmem [shape: f32[16,8], index: 5, kind: input, shape index: {}]   ;;  %s1543_s6 = inlined_call_operand.vmem [shape: f32[2,1,1,4], index: 6, kind: output, shape index: {0}]   ;;  %s1544_s7 = inlined_call_operand.vmem [shape: f32[2,1,8,8], index: 7, kind: output, shape index: {1}]  }
   0x1   :  { %15 = vsyncpa [#allocation9 + $0x1], 0  ;;  %s1339_s24 = smov 0   ;;  %s1341_s25 = smov 0  }
   0x2   :  { %s1343_s26 = smov 0   ;;  %s1345_s27 = smov 0  }
   0x3   :  { %s1347_s28 = smov 0   ;;  %s1349_s29 = smov 0  }
   0x4 LB: > { %s1074_s30 = sadd.s32 4294967295, %s1293_s29   ;;  %s40_s8 = sadd.s32 1, %s1289_s28  ;;  %s1293_s29 = sphi %s1349_s29, %s21_s29   ;;  %s1289_s28 = sphi %s1347_s28, %s1554_s28   ;;  %s1285_s27 = sphi %s1345_s27, %s1553_s27   ;;  %s1281_s26 = sphi %s1343_s26, %s1552_s26   ;;  %s1277_s25 = sphi %s1341_s25, %s1551_s25   ;;  %s1273_s24 = sphi %s1339_s24, %s1550_s24  }
   0x5   : > { %p42_p0 = scmp.ge.s32.totalorder %s40_s8, 2  ;;  %s47_s9 = sadd.s32 1, %s1281_s26 }
   0x6   : > { %p54_p1 = scmp.ne.s32.totalorder %s1281_s26, %s1277_s25  ;;  %p55_p2 = scmp.eq.s32.totalorder %s1293_s29, 0 }
   0x7   : > { %s1556_s8 = smov (%p42_p0, %s40_s8), 0  ;;  %p60_p4 = scmp.ne.s32.totalorder %s1277_s25, %s1273_s24 }
   0x8   : > { %p1375_p3 = por %p55_p2, %p54_p1  ;;  %s44_s11 = ssub.s32 %s1289_s28, %s1556_s8 }
   0x9   : > { %p61_p5 = scmp.eq.s32.totalorder %s1074_s30, 0  ;;  %p45_p6 = scmp.eq.s32.totalorder %s44_s11, 0 }
   0xa   : > { %p1148_p8 = scmp.lt.s32.totalorder %s1293_s29, 2  ;;  %s294_s14 = sand.u32 1, %s1281_s26  }
   0xb   : > { %p1382_p7 = por %p61_p5, %p60_p4  ;;  %s1081_s15 = sshll.u32 %s1289_s28, 7 }
   0xc   : > { %s1388_s13 = scalar_select %p45_p6, %s1281_s26, %s47_s9  }
   0xd   : > { %s1080_s16 = sshll.u32 %s294_s14, 3  ;;  %s958_s19 = scalar_lea.hbm %s1537_s0, %s1081_s15 }
   0xe   : > { %s1395_s20 = scalar_lea.hbm %s958_s19, 768  ;;  %s298_s21 = scalar_lea.vmem [#allocation8], %s1080_s16 }
   0xf   : > { %s306_s22 = sshll.u32 %s298_s21, 4  ;;  %p1401_p9 = pnand %p1148_p8, %p1375_p3  ;;  %s1397_s22 = int_to_ptr.vmem [resolvable:$true] %s306_s22 }
  0x10   : > { %s295_s24 = scalar_lea.sflag [#allocation9], %s294_s14  ;;  %s1242_s30 = scalar_lea.hbm %s958_s19, 896 }
  0x11   : > { %p1213_p12 = scmp.ne.s32.totalorder %s1395_s20, %s1242_s30  ;;  %p1214_p13 = pneg %p1401_p9 }
  0x12   : > { %s1217_s10 = scalar_lea.hbm %s1537_s0, 1024  ;;  %p1218_p2 = scmp.lt.u32.totalorder %s1395_s20, %s1537_s0 }
  0x13   : > { %p1215_p0 = pnand %p1214_p13, %p1213_p12  ;;  %p1219_p3 = scmp.lt.u32.totalorder %s1217_s10, %s1242_s30 }
  0x14   : > { %p1221_p5 = scmp.lt.u32.totalorder %s1242_s30, %s1395_s20 }
  0x15   : > { %p1216_p1 = pneg %p1215_p0  ;;  %p1220_p4 = por %p1219_p3, %p1218_p2 }
  0x17   : > { %p1222_p6 = por %p1221_p5, %p1220_p4 }
  0x19   : > { %p1223_p8 = pnand %p1222_p6, %p1216_p1 }
  0x1b   : > { %1226 = shalt.err (!%p1223_p8)
}
  0x1c   : > { %s1227_s14 = scalar_lea.vmem %s1397_s22, 128  ;;  %s1295_s17 = smov [#allocation8]  }
  0x1d   : > { %p1228_p12 = scmp.ne.s32.totalorder %s1397_s22, %s1227_s14  ;;  %s1232_s18 = sshll.u32 %s1295_s17, 4  ;;  %s1233_s18 = int_to_ptr.vmem [resolvable:$false] %s1232_s18 }
  0x1e   : > { %s1234_s19 = scalar_lea.vmem %s1233_s18, 256  ;;  %p1235_p11 = scmp.lt.s32.totalorder %s1397_s22, %s1233_s18 }
  0x1f   : > { %p1230_p0 = pnand %p1228_p12, %p1214_p13  ;;  %p1236_p2 = scmp.lt.s32.totalorder %s1234_s19, %s1227_s14 }
  0x21   : > { %p1231_p10 = pneg %p1230_p0  ;;  %p1237_p3 = por %p1236_p2, %p1235_p11 }
  0x23   : > { %p1238_p4 = pnand %p1237_p3, %p1231_p10 }
  0x25   : > { %1241 = shalt.err (!%p1238_p4)
}
  0x26   : > { %1147 = dma.hbm_to_vmem [thread:$0]  (!%p1401_p9), %s1395_s20, 128, %s1397_s22, %s295_s24  }
  0x27   : > { %p1548_p1 = scmp.lt.s32.totalorder %s1293_s29, 3  ;;  %p1549_p5 = scmp.ge.s32.totalorder %s1293_s29, 1 }
  0x29   : > { %p327_p13 = pnand %p1549_p5, %p1548_p1 }
  0x2a   : > { %s332_s21 = sand.u32 (!%p327_p13), 1, %s1277_s25  }
  0x2b   : > { %330 = sbr.rel (%p327_p13) target bundleno = 717 (0x2cd), region = 44  ;;  %s1083_s30 = sshll.u32 (!%p327_p13), %s332_s21, 3 }
  0x2c   : > { %s333_s9 = scalar_lea.sflag (!%p327_p13), [#allocation9], %s332_s21  ;;  %s336_s11 = scalar_lea.vmem (!%p327_p13), [#allocation8], %s1083_s30 }
  0x32   : > { %1268 = dma.done.wait (%p1382_p7), %s333_s9, 128  }
  0x33   : > { %1270 = vsyncadd (%p1382_p7), %s333_s9, 4294967168  ;;  %v1296_v0 = vmov 0.0   ;;  %vm1297_vm0 = vmmov 0   ;;  %vm441_vm1 = vcmask 64512   ;;  %v440_v1 = vld [vmem:[%s1539_s2] sm:$0xff]  ;;  %vm515_vm2 = vcmask 130048  }
  0x34   : > { %1112 = vmatprep.subr.mxu0 %v1296_v0  ;;  %1114 = vmatprep.mubr.msk.f32.mxu0 %vm1297_vm0, %v1296_v0  ;;  %v439_v2 = vld [vmem:[%s336_s11] sm:$0xff]  ;;  %517 = vst.msk [vmem:[#allocation3] sm:$0xff] %vm515_vm2, %v1296_v0  ;;  %p406_p7 = scmp.lt.s32.totalorder %s1285_s27, 1  ;;  %v1298_v4 = vmov 0.0|0.0   ;;  %vm518_vm3 = vcmask 122880   ;;  %v606_v23 = vld [vmem:[%s1538_s1 + $0x8] sm:$0xff] }
  0x35   : > { %1121 = vmatprep.mubr.msk.f32.mxu1 %vm1297_vm0, %v1296_v0  ;;  %1113 = vmatpush3.msra.mxu0 %v440_v1  ;;  %v605_v3 = vld [vmem:[%s1538_s1] sm:$0xff]  ;;  %522 = vst.msk [vmem:[#allocation7] sm:$0x1] %vm518_vm3, %v1296_v0  ;;  %519 = vst.msk [vmem:[#allocation4] sm:$0x1] %vm518_vm3, %v1296_v0  ;;  %v798_v29 = vld [vmem:[%s1542_s5 + $0x8] sm:$0xff] }
  0x36   : > { %1115 = vmatmul.mubr.msk.f32.vlgmr.msra.gmra.mrb[0].mxu0 %vm441_vm1, %v439_v2  ;;  %s1558_s27 = smov (!%p406_p7, %s1285_s27), 1  ;;  %1136 = vmatprep.subr.bf16.mxu1 %v1298_v4  ;;  %v528_v8 = vld [vmem:[%s1541_s4] sm:$0xff]  ;;  %520 = vst.msk [vmem:[#allocation5] sm:$0x1] %vm518_vm3, %v1296_v0  ;;  %521 = vst.msk [vmem:[#allocation6] sm:$0x1] %vm518_vm3, %v1296_v0 }
  0x37   : > { %s1096_s12 = sshll.u32 %s1558_s27, 3  ;;  %1126 = vmatprep.mubr.msk.f32.mxu0 %vm441_vm1, %v605_v3  ;;  %v797_v28 = vld [vmem:[%s1542_s5] sm:$0xff]  ;;  %s427_s10 = scalar_lea.vmem %s1543_s6, %s1558_s27  ;;  %vm902_vm10 = vcmask 24576  }
  0x38   : > { %s413_s16 = scalar_lea.vmem %s1540_s3, %s1096_s12  ;;  %v1140_v30 = vpack.c.bf16 %v798_v29, %v797_v28  ;;  %s434_s23 = scalar_lea.vmem %s1544_s7, %s1096_s12 }
  0x39   : > { %v1098_v5 = vld [vmem:[%s413_s16] sm:$0xff]  }
  0x3a   : > { %v1461_v6 = vunpack.c.l.bf16 %v1098_v5  ;;  %v1463_v7 = vunpack.c.h.bf16 %v1098_v5  ;;  %1138 = vmatpush3.bf16.msra.mxu1 %v1098_v5 }
  0x3b   : > { %1139 = vmatprep.subr.bf16.mxu1 %v1298_v4  ;;  %v527_v24 = vld [vmem:[#allocation3] sm:$0xff] }
  0x3c   : > { %v782_v9 = vsel %vm515_vm2, %v1461_v6, 0.0  ;;  %v783_v10 = vsel %vm515_vm2, %v1463_v7, 0.0  ;;  %v781_v17 = vld [vmem:[#allocation7] sm:$0x1] }
  0x3d   : > { %v784_v11 = vadd.f32 %v783_v10, %v782_v9  ;;  %1122 = vmatmul.mubr.msk.f32.vlgmr.msra.gmra.mrb[0].mxu1 %vm515_vm2, %v528_v8 }
  0x3e   : > { %1133 = vmatprep.mubr.msk.f32.mxu1 %vm1297_vm0, %v1296_v0  ;;  %1141 = vmatpush3.bf16.msra.mxu1 %v1140_v30 }
  0x3f   : > { %v785_v12 = vrot.slane %v784_v11, 4 }
  0x41   : > { %v786_v13 = vadd.f32 %v785_v12, %v784_v11 }
  0x43   : > { %v787_v14 = vrot.slane %v786_v13, 2 }
  0x45   : > { %v788_v15 = vadd.f32 %v787_v14, %v786_v13 }
  0x47   : > { %v789_v16 = vrot.slane %v788_v15, 1 }
  0x49   : > { %v790_v18 = vadd.f32 %v789_v16, %v788_v15 }
  0x4b   : > { %v791_v19 = vadd.f32 %v790_v18, %v781_v17 }
  0x4d   : > { %792 = vst.msk [vmem:[#allocation7] sm:$0x1] %vm518_vm3, %v791_v19 }
 0x109   : > { %v511_v20 = vpop.f32.mrb[0].mxu0 }
 0x10a   : > { %516 = vst.msk [vmem:[#allocation2] sm:$0xff] %vm515_vm2, %v511_v20  ;;  %v1116_v21 = vpop.f32.mrb[1].mxu0 }
 0x110   : > { %v599_v25 = vpop.f32.mrb[0].mxu1 }
 0x111   : > { %v607_v22 = vld [vmem:[#allocation2] sm:$0xff]  ;;  %v603_v26 = vadd.f32 %v599_v25, %v527_v24  ;;  %v1123_v27 = vpop.f32.mrb[1].mxu1 }
 0x112   : > { %1124 = vmatprep.subr.mxu0 %v607_v22 }
 0x113   : > { %1125 = vmatpush3.msra.mxu0 %v607_v22  ;;  %604 = vst.msk [vmem:[#allocation3] sm:$0xff] %vm515_vm2, %v603_v26 }
 0x114   : > { %1127 = vmatmul.mubr.msk.f32.vlgmr.msra.gmra.mrb[2].mxu0 %vm441_vm1, %v606_v23 }
 0x11a   : > { %v796_v31 = vld [vmem:[#allocation3] sm:$0xff] }
 0x11b   : > { %1134 = vmatmul.mubr.msk.f32.vlgmr.msra.gmra.mrb[2].mxu1 %vm515_vm2, %v796_v31 }
 0x1e7   : > { %v1128_v32 = vpop.f32.mrb[2].mxu0 }
 0x1e8   : > { %v691_v33 = vand.u32 2147483647, %v1128_v32  ;;  %v681_v34 = vpop.f32.mrb[3].mxu0  ;;  %v699_v44 = vsub.f32 0.0, %v1128_v32  ;;  %vm721_vm4 = vcmp.ge.f32.partialorder %v1128_v32, 0.0 }
 0x1e9   : > { %v690_v35 = vand.u32 2147483647, %v681_v34  ;;  %v698_v45 = vsub.f32 0.0, %v681_v34  ;;  %vm720_vm5 = vcmp.ge.f32.partialorder %v681_v34, 0.0 }
 0x1ea   : > { %v693_v36 = vsub.f32 0.0, %v691_v33  ;;  %v701_v48 = vmax.f32 %v699_v44, 0.0 }
 0x1eb   : > { %v692_v37 = vsub.f32 0.0, %v690_v35  ;;  %v700_v55 = vmax.f32 %v698_v45, 0.0 }
 0x1ec   : > { %v696_v38 = vmul.f32 1.442695, %v693_v36 }
 0x1ed   : > { %v694_v39 = vmul.f32 1.442695, %v692_v37 }
 0x1ee   : > { %1200 = vpow2.f32 %v696_v38 }
 0x1ef   : > { %1202 = vpow2.f32 %v694_v39 }
 0x1f8   : > { %v1201_v40 = vpop.eup %1200 }
 0x1f9   : > { %v1203_v41 = vpop.eup %1202  ;;  %v703_v42 = vadd.f32 1.0, %v1201_v40  ;;  %v723_v50 = vsel %vm721_vm4, 1.0, %v1201_v40 }
 0x1fa   : > { %v702_v43 = vadd.f32 1.0, %v1203_v41  ;;  %v722_v57 = vsel %vm720_vm5, 1.0, %v1203_v41 }
 0x1fb   : > { %1204 = vlog2.f32 %v703_v42 }
 0x1fc   : > { %1206 = vrcp.f32 %v703_v42 }
 0x1fd   : > { %1208 = vlog2.f32 %v702_v43 }
 0x1fe   : > { %1210 = vrcp.f32 %v702_v43 }
 0x205   : > { %v1205_v46 = vpop.eup %1204 }
 0x206   : > { %v1207_v47 = vpop.eup %1206  ;;  %v707_v49 = vmul.f32 0.6931472, %v1205_v46 }
 0x207   : > { %v1209_v51 = vpop.eup %1208  ;;  %v727_v52 = vmul.f32 %v1207_v47, %v723_v50 }
 0x208   : > { %v1211_v53 = vpop.eup %1210  ;;  %v709_v54 = vadd.f32 %v707_v49, %v701_v48  ;;  %v705_v56 = vmul.f32 0.6931472, %v1209_v51 }
 0x209   : > { %v729_v58 = vsub.f32 1.0, %v727_v52  ;;  %v743_v59 = vmul.f32 %v1463_v7, %v727_v52  ;;  %v725_v60 = vmul.f32 %v1211_v53, %v722_v57  ;;  %v771_v63 = vsel %vm515_vm2, %v727_v52, 0.0  ;;  %v885_v53 = vld [vmem:[#allocation7] sm:$0x1] }
 0x20a   : > { %v713_v61 = vmul.f32 0.1, %v709_v54  ;;  %v708_v62 = vadd.f32 %v705_v56, %v700_v55  ;;  %v711_v19 = vadd.f32 %v1128_v32, %v709_v54  ;;  %v886_v57 = vsel %vm518_vm3, %v885_v53, 0.0 }
 0x20b   : > { %v731_v0 = vmul.f32 %v1128_v32, %v729_v58  ;;  %v728_v1 = vsub.f32 1.0, %v725_v60  ;;  %v742_v2 = vmul.f32 %v1461_v6, %v725_v60  ;;  %v759_v3 = vsel %vm515_vm2, %v743_v59, 0.0 }
 0x20c   : > { %v715_v4 = vsub.f32 %v713_v61, %v1128_v32  ;;  %v712_v5 = vmul.f32 0.1, %v708_v62  ;;  %v770_v8 = vsel %vm515_vm2, %v725_v60, 0.0  ;;  %v710_v25 = vadd.f32 %v708_v62, %v681_v34 }
 0x20d   : > { %v733_v9 = vadd.f32 %v731_v0, %v709_v54  ;;  %v730_v10 = vmul.f32 %v728_v1, %v681_v34  ;;  %v758_v11 = vsel %vm515_vm2, %v742_v2, 0.0  ;;  %v772_v12 = vadd.f32 %v771_v63, %v770_v8  ;;  %v744_v54 = vld [vmem:[#allocation4] sm:$0x1]  ;;  %v868_v63 = vpop.f32.mrb[2].mxu1 }
 0x20e   : > { %v714_v13 = vsub.f32 %v712_v5, %v681_v34  ;;  %v760_v14 = vadd.f32 %v759_v3, %v758_v11  ;;  %v717_v15 = vmul.f32 %v1463_v7, %v715_v4  ;;  %v757_v34 = vld [vmem:[#allocation5] sm:$0x1]  ;;  %872 = vst.msk [vmem:[%s434_s23] sm:$0xff] %vm441_vm1, %v868_v63  ;;  %v1135_v0 = vpop.f32.mrb[3].mxu1  ;;  %v889_v1 = vlaneseq }
 0x20f   : > { %v735_v16 = vmul.f32 2.88539, %v733_v9  ;;  %v732_v17 = vadd.f32 %v730_v10, %v708_v62  ;;  %v773_v18 = vrot.slane %v772_v12, 4 }
 0x210   : > { %v761_v20 = vrot.slane %v760_v14, 4  ;;  %v716_v22 = vmul.f32 %v1461_v6, %v714_v13  ;;  %v719_v27 = vadd.f32 %v717_v15, %v711_v19  ;;  %v769_v6 = vld [vmem:[#allocation6] sm:$0x1]  ;;  %v890_v2 = vand.u32 127, %v889_v1 }
 0x211   : > { %v1092_v21 = vadd.f32 -0.5, %v735_v16  ;;  %v734_v23 = vmul.f32 2.88539, %v732_v17  ;;  %v774_v24 = vadd.f32 %v773_v18, %v772_v12 }
 0x212   : > { %v762_v26 = vadd.f32 %v761_v20, %v760_v14  ;;  %v718_v35 = vadd.f32 %v716_v22, %v710_v25  ;;  %vm891_vm6 = vcmp.eq.s32.totalorder %v890_v2, 0  ;;  %vm893_vm7 = vcmp.eq.s32.totalorder %v890_v2, 1 }
 0x213   : > { %v739_v28 = vmax.f32 %v1092_v21, 0.5  ;;  %v1091_v29 = vadd.f32 -0.5, %v734_v23  ;;  %v775_v30 = vrot.slane %v774_v24, 2  ;;  %vm896_vm8 = vcmp.eq.s32.totalorder %v890_v2, 2 }
 0x214   : > { %v763_v31 = vrot.slane %v762_v26, 2  ;;  %vm899_vm9 = vcmp.eq.s32.totalorder %v890_v2, 3 }
 0x215   : > { %v741_v33 = vmul.f32 %v739_v28, %v719_v27  ;;  %v738_v7 = vmax.f32 %v1091_v29, 0.5  ;;  %v776_v36 = vadd.f32 %v775_v30, %v774_v24 }
 0x216   : > { %v764_v37 = vadd.f32 %v763_v31, %v762_v26 }
 0x217   : > { %v740_v38 = vmul.f32 %v738_v7, %v718_v35  ;;  %v746_v32 = vsel %vm515_vm2, %v741_v33, 0.0  ;;  %v777_v39 = vrot.slane %v776_v36, 1 }
 0x218   : > { %v765_v40 = vrot.slane %v764_v37, 1 }
 0x219   : > { %v745_v41 = vsel %vm515_vm2, %v740_v38, 0.0  ;;  %v778_v42 = vadd.f32 %v777_v39, %v776_v36 }
 0x21a   : > { %v747_v43 = vadd.f32 %v746_v32, %v745_v41  ;;  %v766_v44 = vadd.f32 %v765_v40, %v764_v37 }
 0x21b   : > { %v779_v45 = vadd.f32 %v778_v42, %v769_v6 }
 0x21c   : > { %v748_v46 = vrot.slane %v747_v43, 4  ;;  %v767_v47 = vadd.f32 %v766_v44, %v757_v34 }
 0x21d   : > { %780 = vst.msk [vmem:[#allocation6] sm:$0x1] %vm518_vm3, %v779_v45 }
 0x21e   : > { %v749_v48 = vadd.f32 %v748_v46, %v747_v43  ;;  %768 = vst.msk [vmem:[#allocation5] sm:$0x1] %vm518_vm3, %v767_v47 }
 0x220   : > { %v750_v49 = vrot.slane %v749_v48, 2 }
 0x222   : > { %v751_v50 = vadd.f32 %v750_v49, %v749_v48 }
 0x224   : > { %v752_v51 = vrot.slane %v751_v50, 1  ;;  %v881_v52 = vld [vmem:[#allocation6] sm:$0x1] }
 0x225   : > { %v882_v55 = vsel %vm518_vm3, %v881_v52, 0.0  ;;  %v877_v61 = vld [vmem:[#allocation5] sm:$0x1] }
 0x226   : > { %v753_v56 = vadd.f32 %v752_v51, %v751_v50  ;;  %883 = vadd.xlane.f32.xlu1 %v882_v55  ;;  %v878_v62 = vsel %vm518_vm3, %v877_v61, 0.0 }
 0x228   : > { %v754_v58 = vadd.f32 %v753_v56, %v744_v54 }
 0x22a   : > { %756 = vst.msk [vmem:[#allocation4] sm:$0x1] %vm518_vm3, %v754_v58  ;;  %887 = vadd.xlane.f32.xlu1 %v886_v57 }
 0x231   : > { %v873_v59 = vld [vmem:[#allocation4] sm:$0x1] }
 0x232   : > { %v874_v60 = vsel %vm518_vm3, %v873_v59, 0.0 }
 0x233   : > { %875 = vadd.xlane.f32.xlu0 %v874_v60 }
 0x237   : > { %879 = vadd.xlane.f32.xlu0 %v878_v62 }
 0x2b3   : > { %v884_v3 = vpop.xlane.xlu1 %883 }
 0x2b4   : > { %v897_v12 = vsel %vm896_vm8, %v884_v3, 0.0 }
 0x2b7   : > { %v888_v8 = vpop.xlane.xlu1 %887 }
 0x2b8   : > { %v900_v13 = vsel %vm899_vm9, %v888_v8, 0.0 }
 0x2c0   : > { %v876_v4 = vpop.xlane.xlu0 %875 }
 0x2c1   : > { %v892_v9 = vsel %vm891_vm6, %v876_v4, 0.0 }
 0x2c4   : > { %v880_v5 = vpop.xlane.xlu0 %879 }
 0x2c5   : > { %v894_v10 = vsel %vm893_vm7, %v880_v5, 0.0 }
 0x2c6   : > { %v895_v11 = vadd.f32 %v894_v10, %v892_v9 }
 0x2c8   : > { %v898_v14 = vadd.f32 %v897_v12, %v895_v11 }
 0x2ca   : > { %v901_v15 = vadd.f32 %v900_v13, %v898_v14 }
 0x2cc   : > { %903 = vst.msk [vmem:[%s427_s10] sm:$0x1] %vm902_vm10, %v901_v15 }
 0x2cd PF: > { %s21_s29 = sadd.s32 1, %s1293_s29   ;;  %s1550_s24 = smov %s1277_s25 }
 0x2ce   : > { %p18_p9 = scmp.ge.s32.totalorder %s21_s29, 4   ;;  %s1551_s25 = smov %s1281_s26 }
 0x2cf   : > { %s1552_s26 = smov %s1388_s13  ;;  %s1553_s27 = smov %s1289_s28 }
 0x2d0   : > { %s1554_s28 = smov %s1556_s8  ;;  %20 = sbr.rel (!%p18_p9) target bundleno = 4 (0x4), region = 113 }
 0x2d7   :  { %947 = vsyncpa [#allocation9], 1 }
 0x2d8   :  { %949 = vsyncpa [#allocation9 + $0x1], 1 }

</bundles_post_ra>
